<compile_context>
chip_gen: v6e
topology: v6e:2x2x1
jax: 0.10.0
libtpu: 0.0.40
codegen_flags: <defaults>
</compile_context>

<pallas_src>
import jax
import jax.numpy as jnp
from jax.experimental import pallas as pl
from jax.experimental.pallas import tpu as pltpu


# ----------------------------------------------------------------------------
# Parameter init mirroring Sampler.__init__ (3 Linear layers).
# These parameters are DEAD in forward(); per the perf review this is kept out
# of the forward call graph and is not invoked in the demo below.
# ----------------------------------------------------------------------------
def init_sampler_params(hidden_size, dtype=jnp.float32):
    key = jax.random.PRNGKey(0)
    ks = jax.random.split(key, 6)
    bound = 1.0 / float(jnp.sqrt(jnp.float32(hidden_size)))

    def lin(kw, kb):
        w = jax.random.uniform(kw, (hidden_size, hidden_size), dtype,
                               minval=-bound, maxval=bound)
        b = jax.random.uniform(kb, (hidden_size,), dtype,
                               minval=-bound, maxval=bound)
        return w, b

    return {
        "mlp1": lin(ks[0], ks[1]),
        "mlp2mu": lin(ks[2], ks[3]),
        "mlp2var": lin(ks[4], ks[5]),
    }


# ----------------------------------------------------------------------------
# Production forward: identity, zero data movement.
# ----------------------------------------------------------------------------
def sampler_forward(x):
    """Sampler.forward(input) == input.  Cheapest correct implementation: do not
    touch HBM at all (2x-HBM-traffic copy kernel eliminated per perf review)."""
    return x


# ----------------------------------------------------------------------------
# Optional Pallas path: explicit op boundary -> pure DMA copy (no vreg traffic).
# ----------------------------------------------------------------------------
def _dma_identity_kernel(x_hbm, o_hbm, sem):
    # Single HBM->HBM DMA: the DMA engine streams at HBM bandwidth while the
    # TensorCore stays idle.  No VMEM tiles, no masked vst for F < 128 lanes.
    cp = pltpu.make_async_copy(x_hbm, o_hbm, sem)
    cp.start()
    cp.wait()


def sampler_forward_pallas(x):
    """Identity via Pallas, for callers that require a physically distinct
    output buffer / custom-call boundary."""
    return pl.pallas_call(
        _dma_identity_kernel,
        out_shape=jax.ShapeDtypeStruct(x.shape, x.dtype),
        in_specs=[pl.BlockSpec(memory_space=pl.ANY)],
        out_specs=pl.BlockSpec(memory_space=pl.ANY),
        scratch_shapes=[pltpu.SemaphoreType.DMA],
    )(x)


# TODO(synk): the VAE re-parameterization (mlp1 -> tanh -> mu/logvar ->
# eps*std+mu) in the original source is dead code (a string literal), so it is
# intentionally not part of the forward path.


if __name__ == "__main__":
    hidden_size = 32
    batch = 2
    in_features = hidden_size + 6  # dead-code slice implies input width = hidden+6

    key = jax.random.PRNGKey(0)
    x = jax.random.normal(key, (batch, in_features), dtype=jnp.float32)

    # Production path: zero bytes moved.
    y_fast = sampler_forward(x)
    assert y_fast is x

    # Pallas path (explicit op boundary): single HBM->HBM DMA.
    y = sampler_forward_pallas(x)
    y = jax.block_until_ready(y)

    assert y.shape == x.shape and y.dtype == x.dtype
    assert bool(jnp.array_equal(y, x))
    print("KERNEL_OK")
</pallas_src>

<mosaic_0001>
module attributes {stable_mosaic.version = 11 : i64} {
  func.func @_dma_identity_kernel(%arg0: memref<2x38xf32, #tpu.memory_space<any>>, %arg1: memref<2x38xf32, #tpu.memory_space<any>>, %arg2: memref<!tpu.dma_semaphore, #tpu.memory_space<semaphore_mem>>) attributes {dimension_semantics = [], scalar_prefetch = 0 : i64, scratch_operands = 1 : i64, tpu.core_type = #tpu.core_type<tc>} {
    tpu.enqueue_dma source(%arg0 : memref<2x38xf32, #tpu.memory_space<any>>) target(%arg1 : memref<2x38xf32, #tpu.memory_space<any>>) target_semaphore(%arg2 : memref<!tpu.dma_semaphore, #tpu.memory_space<semaphore_mem>>)
    tpu.wait_dma2 semaphore(%arg2 : memref<!tpu.dma_semaphore, #tpu.memory_space<semaphore_mem>>) src(%arg0 : memref<2x38xf32, #tpu.memory_space<any>>) dst(%arg1 : memref<2x38xf32, #tpu.memory_space<any>>)
    return
  }
}

</mosaic_0001>

<bundles_post_ra>
// kernel: tpu_custom_call.1
= control target key start
LH: loop header
LB: loop body
LE: loop exit
PB: predicated region body
PF: predicated region fallthrough
CT: control target
= control target key end

     0   :  { %s28_s6 = smov [#allocation2]   ;;  %s29_s7 = smov 131072   ;;  %s47_s0 = inlined_call_operand.hbm [shape: f32[2,38], index: 0, kind: input, shape index: {}]   ;;  %s48_s1 = inlined_call_operand.hbm [shape: f32[2,38], index: 1, kind: output, shape index: {}]  }
   0x1   :  { %s30_s8 = smov 0  }
   0x2   :  { %12 = dma.general %s47_s0, 32, %s48_s1, %s28_s6, %s29_s7, [#allocation4], %s30_s8, 0  }
   0x3   :  { %26 = dma.done.wait [#allocation2], 32 }
   0x4   :  { %27 = vsyncadd [#allocation2], 4294967264 }
   0x5   :  { %16 = vsyncmov [#allocation2] }
   0x8   :  { %s17_s13 = vpop.sfrf %16 }
   0x9   :  { %p22_p0 = scmp.ne.s32.totalorder %s17_s13, 0 }
   0xb   :  { %21 = shalt.err (%p22_p0)  }

</bundles_post_ra>
